<compile_context>
chip_gen: v7x
topology: tpu7x:2x2x1
jax: 0.10.0
libtpu: 0.0.40
codegen_flags: <defaults>
</compile_context>

<pallas_src>
import functools

import jax
import jax.numpy as jnp
from jax import lax
from jax.experimental import pallas as pl
from jax.experimental.pallas import tpu as pltpu


def find_multiple(n: int, k: int) -> int:
    if n % k == 0:
        return n
    return n + k - n % k


def _round_up(n: int, k: int) -> int:
    return ((n + k - 1) // k) * k


# ----------------------------------------------------------------------------
# Hardware introspection (best-effort; safe fallbacks).
# ----------------------------------------------------------------------------
def _tpu_info():
    try:
        return pltpu.get_tpu_info()
    except Exception:
        return None


def _vmem_capacity_bytes() -> int:
    info = _tpu_info()
    if info is not None:
        for attr in ("vmem_capacity_bytes", "vmem_bytes", "vmem_size_bytes"):
            v = getattr(info, attr, None)
            if isinstance(v, int) and v > 0:
                return v
    return 128 * 1024 * 1024  # v5e/v6e default; v7x reports 64 MiB/TC itself.


def _num_tensorcores() -> int:
    info = _tpu_info()
    if info is not None:
        for attr in ("num_tensorcores", "tensorcores_per_chip", "num_cores",
                     "core_count"):
            v = getattr(info, attr, None)
            if isinstance(v, int) and v > 0:
                return v
    return 1


# ----------------------------------------------------------------------------
# Tile selection.
# ----------------------------------------------------------------------------
def _pick_tile_hidden(hidden: int, cap: int) -> int:
    """Largest hidden tile <= cap; prefer 256-aligned divisors of `hidden`."""
    if hidden <= cap:
        return hidden
    for align in (256, 128):
        t = (cap // align) * align
        while t >= align:
            if hidden % t == 0:
                return t
            t -= align
    # No exact divisor: largest 128-aligned tile (hidden axis gets zero-padded).
    return max(128, (cap // 128) * 128)


def _pick_tiles(rows, dim, hidden, x_item, w_item, out_item, sublane, budget,
                tm_cap=1024, th_cap=1024):
    tm = min(_round_up(rows, sublane), _round_up(tm_cap, sublane))
    th = _pick_tile_hidden(hidden, th_cap)

    def fits(tm_, th_):
        x_blk = tm_ * dim * x_item
        w_blk = 3 * th_ * dim * w_item           # w1 + w3 + w2 tiles
        o_blk = tm_ * dim * out_item
        acc = tm_ * dim * 4                      # f32 accumulator scratch
        tmp = 3 * tm_ * th_ * 4                  # a1 / a3 / gate f32 temporaries
        # double-buffered I/O + resident scratch/temporaries
        return 2 * (x_blk + w_blk + o_blk) + acc + tmp <= budget

    # Shrink th first (arithmetic intensity depends only on tm), keep tm large.
    while not fits(tm, th):
        if th > 512:
            th = _pick_tile_hidden(hidden, th // 2)
        elif tm > 512:
            tm = max(sublane, _round_up(tm // 2, sublane))
        elif th > 256:
            th = _pick_tile_hidden(hidden, 256)
        elif tm > 8 * sublane:
            tm = max(sublane, _round_up(tm // 2, sublane))
        elif th > 128:
            th = _pick_tile_hidden(hidden, 128)
        elif tm > sublane:
            tm = max(sublane, _round_up(tm // 2, sublane))
        else:
            break
    return tm, th


# ----------------------------------------------------------------------------
# Kernel.
# ----------------------------------------------------------------------------
def _ffn_kernel(seed_ref, x_ref, w1_ref, w3_ref, w2_ref, o_ref, acc_ref, *,
                dropout_p):
    """One (row_tile, hidden_tile) step of the fused SwiGLU FFN.

    seed_ref: (1,) int32 SMEM (scalar-prefetch) -- dropout seed
    x_ref   : (tm, dim)  activation tile
    w1_ref  : (th, dim)  w1 tile (gate projection, nn.Linear layout)
    w3_ref  : (th, dim)  w3 tile (up projection)
    w2_ref  : (dim, th)  w2 tile (down projection)
    o_ref   : (tm, dim)  output tile (written on last hidden step)
    acc_ref : (tm, dim)  f32 VMEM accumulator, resident across hidden steps
    """
    h = pl.program_id(1)

    @pl.when(h == 0)
    def _init():
        acc_ref[...] = jnp.zeros_like(acc_ref)

    x = x_ref[...]
    # Contract on the last dims of both operands (original weight layouts;
    # no wrapper-side transpose / extra HBM pass).
    dn = (((1,), (1,)), ((), ()))
    a1 = lax.dot_general(x, w1_ref[...], dn, preferred_element_type=jnp.float32)
    a3 = lax.dot_general(x, w3_ref[...], dn, preferred_element_type=jnp.float32)
    # SiLU(a1) * a3 : exp and approx reciprocal both land on the EUP slot,
    # keeping the VALU free under the MXU.
    gate = a1 * pl.reciprocal(1.0 + jnp.exp(-a1), approx=True) * a3
    acc_ref[...] += lax.dot_general(gate.astype(w2_ref.dtype), w2_ref[...], dn,
                                    preferred_element_type=jnp.float32)

    @pl.when(h == pl.num_programs(1) - 1)
    def _store():
        out = acc_ref[...]
        if dropout_p > 0.0:
            # Fused inverted dropout: per-row-tile PRNG stream.
            pltpu.prng_seed(seed_ref[0] + pl.program_id(0))
            bits = pltpu.prng_random_bits(out.shape)
            if bits.dtype != jnp.uint32:
                bits = pltpu.bitcast(bits, jnp.uint32)
            keep_thresh = min(int(round((1.0 - dropout_p) * 2.0 ** 32)),
                              2 ** 32 - 1)
            keep = bits < jnp.uint32(keep_thresh)
            out = jnp.where(keep, out * (1.0 / (1.0 - dropout_p)), 0.0)
        o_ref[...] = out.astype(o_ref.dtype)


# ----------------------------------------------------------------------------
# Wrapper.
# ----------------------------------------------------------------------------
def feed_forward(x, w1, w2, w3, *, dropout_p=0.0, dropout_seed=None,
                 matmul_in_bf16=False, tile_rows=None, tile_hidden=None):
    """Fused SwiGLU FeedForward.

    Weights use the PyTorch nn.Linear layout:
        w1, w3 : (hidden_dim, dim)
        w2     : (dim, hidden_dim)
    Output dtype == x.dtype (matches the PyTorch module, which runs with a
    single uniform parameter/activation dtype).
    """
    orig_shape = x.shape
    dim = orig_shape[-1]
    hidden = w1.shape[0]
    assert w1.shape == (hidden, dim) and w3.shape == (hidden, dim)
    assert w2.shape == (dim, hidden)

    rows = 1
    for s in orig_shape[:-1]:
        rows *= s
    x2d = x.reshape(rows, dim)
    out_dtype = x.dtype

    if matmul_in_bf16 and jnp.dtype(x.dtype).itemsize >= 4:
        # Optional: MXU-native bf16 matmuls with f32 accumulation.
        x2d = x2d.astype(jnp.bfloat16)
        w1 = w1.astype(jnp.bfloat16)
        w3 = w3.astype(jnp.bfloat16)
        w2 = w2.astype(jnp.bfloat16)

    x_item = jnp.dtype(x2d.dtype).itemsize
    w_item = jnp.dtype(w1.dtype).itemsize
    out_item = jnp.dtype(out_dtype).itemsize
    sublane = 8 if x_item >= 4 else (16 if x_item == 2 else 32)

    # Size tiles from the actual chip VMEM (v5e/v6e: 128 MiB, v7x: 64 MiB/TC),
    # leaving headroom for Mosaic internal scratch.
    vmem_cap = _vmem_capacity_bytes()
    vmem_limit = min(int(vmem_cap * 0.80), vmem_cap - (12 << 20))
    vmem_limit = max(vmem_limit, 32 << 20)
    budget = int(vmem_limit * 0.85)

    auto_tm, auto_th = _pick_tiles(rows, dim, hidden, x_item, w_item, out_item,
                                   sublane, budget)
    tm = tile_rows if tile_rows is not None else auto_tm
    th = tile_hidden if tile_hidden is not None else auto_th

    # Multi-TensorCore chips (v7x): keep >= num_cores row tiles so the
    # "parallel" axis actually feeds every core.
    cores = _num_tensorcores()
    if tile_rows is None and cores > 1 and rows > sublane:
        per_core = max(sublane, _round_up(pl.cdiv(rows, cores), sublane))
        tm = min(tm, per_core)

    # Zero-pad rows / hidden only if a tile does not divide the axis (rare:
    # th is chosen as a divisor of hidden whenever possible).  Padded hidden
    # units are numerically inert: padded w1/w3 rows make the gate columns 0
    # and the matching padded w2 columns contribute 0 to the reduction.
    rows_p = _round_up(rows, tm)
    hidden_p = _round_up(hidden, th)
    if rows_p != rows:
        x2d = jnp.pad(x2d, ((0, rows_p - rows), (0, 0)))
    if hidden_p != hidden:
        pad_h = hidden_p - hidden
        w1 = jnp.pad(w1, ((0, pad_h), (0, 0)))
        w3 = jnp.pad(w3, ((0, pad_h), (0, 0)))
        w2 = jnp.pad(w2, ((0, 0), (0, pad_h)))

    grid = (rows_p // tm, hidden_p // th)
    n_row_tiles = grid[0]

    if dropout_p > 0.0:
        if dropout_seed is None:
            raise ValueError(
                "feed_forward: dropout_p > 0 requires an explicit "
                "dropout_seed (per-step) to avoid a fixed dropout mask.")
        seed_arr = jnp.asarray(dropout_seed, jnp.int32).reshape((1,))
    else:
        seed_arr = jnp.zeros((1,), jnp.int32)

    cost = pl.CostEstimate(
        flops=6 * rows * dim * hidden,
        transcendentals=2 * rows * hidden,
        bytes_accessed=(rows_p * dim * (x_item + out_item)
                        + n_row_tiles * 3 * dim * hidden_p * w_item),
    )

    kernel = functools.partial(_ffn_kernel, dropout_p=float(dropout_p))

    out2d = pl.pallas_call(
        kernel,
        out_shape=jax.ShapeDtypeStruct((rows_p, dim), out_dtype),
        grid_spec=pltpu.PrefetchScalarGridSpec(
            num_scalar_prefetch=1,
            grid=grid,
            in_specs=[
                pl.BlockSpec((tm, dim), lambda i, h, seed: (i, 0)),   # x
                pl.BlockSpec((th, dim), lambda i, h, seed: (h, 0)),   # w1
                pl.BlockSpec((th, dim), lambda i, h, seed: (h, 0)),   # w3
                pl.BlockSpec((dim, th), lambda i, h, seed: (0, h)),   # w2
            ],
            out_specs=pl.BlockSpec((tm, dim), lambda i, h, seed: (i, 0)),
            scratch_shapes=[pltpu.VMEM((tm, dim), jnp.float32)],
        ),
        compiler_params=pltpu.CompilerParams(
            dimension_semantics=("parallel", "arbitrary"),
            vmem_limit_bytes=int(vmem_limit),
        ),
        cost_estimate=cost,
    )(seed_arr, x2d, w1, w3, w2)

    out = out2d[:rows].reshape(orig_shape)
    return out


def feed_forward_ref(x, w1, w2, w3):
    a1 = jnp.einsum("...d,hd->...h", x, w1)
    a3 = jnp.einsum("...d,hd->...h", x, w3)
    gate = (a1 * jax.nn.sigmoid(a1)) * a3
    return jnp.einsum("...h,dh->...d", gate, w2)


if __name__ == "__main__":
    key = jax.random.PRNGKey(0)

    # Module hyper-parameters (small, consistent with the PyTorch spec).
    batch, seq, dim = 2, 8, 32
    ffn_dim_multiplier = None
    multiple_of = 128
    ffn_dropout_p = 0.0

    hidden_dim = 4 * dim
    hidden_dim = int(2 * hidden_dim / 3)
    if ffn_dim_multiplier is not None:
        hidden_dim = int(ffn_dim_multiplier * hidden_dim)
    hidden_dim = find_multiple(hidden_dim, multiple_of)   # -> 128

    kx, k1, k2, k3 = jax.random.split(key, 4)
    x = jax.random.normal(kx, (batch, seq, dim), dtype=jnp.float32)
    w1 = jax.random.normal(k1, (hidden_dim, dim), jnp.float32) * (dim ** -0.5)
    w3 = jax.random.normal(k3, (hidden_dim, dim), jnp.float32) * (dim ** -0.5)
    w2 = jax.random.normal(k2, (dim, hidden_dim), jnp.float32) * (hidden_dim ** -0.5)

    out = feed_forward(x, w1, w2, w3, dropout_p=ffn_dropout_p)
    out = jax.block_until_ready(out)

    ref = feed_forward_ref(x, w1, w2, w3)
    assert out.shape == x.shape and out.dtype == x.dtype
    max_err = float(jnp.max(jnp.abs(out - ref)))
    assert jnp.allclose(out, ref, atol=1e-2, rtol=1e-2), f"mismatch vs ref: {max_err}"
    print("KERNEL_OK")
</pallas_src>

<mosaic_0001>
module attributes {stable_mosaic.version = 11 : i64} {
  func.func @_ffn_kernel(%arg0: i32, %arg1: i32, %arg2: memref<1xi32, #tpu.memory_space<smem>>, %arg3: memref<16x32xf32, #tpu.memory_space<vmem>>, %arg4: memref<128x32xf32, #tpu.memory_space<vmem>>, %arg5: memref<128x32xf32, #tpu.memory_space<vmem>>, %arg6: memref<32x128xf32, #tpu.memory_space<vmem>>, %arg7: memref<16x32xf32, #tpu.memory_space<vmem>>, %arg8: memref<16x32xf32, #tpu.memory_space<vmem>>) attributes {dimension_semantics = [#tpu.dimension_semantics<parallel>, #tpu.dimension_semantics<arbitrary>], iteration_bounds = array<i64: 1, 1>, scalar_prefetch = 1 : i64, scratch_operands = 1 : i64, tpu.core_type = #tpu.core_type<tc>, window_params = [{transform_indices = @transform_0, window_bounds = array<i64: 16, 32>}, {transform_indices = @transform_1, window_bounds = array<i64: 128, 32>}, {transform_indices = @transform_2, window_bounds = array<i64: 128, 32>}, {transform_indices = @transform_3, window_bounds = array<i64: 32, 128>}, {transform_indices = @transform_4, window_bounds = array<i64: 16, 32>}]} {
    %c0_i32 = arith.constant 0 : i32
    %0 = arith.cmpi eq, %arg1, %c0_i32 : i32
    %1 = arith.extui %0 : i1 to i32
    %c0_i32_0 = arith.constant 0 : i32
    %2 = arith.cmpi ne, %1, %c0_i32_0 : i32
    scf.if %2 {
      %cst_18 = arith.constant 0.000000e+00 : f32
      %24 = vector.broadcast %cst_18 : f32 to vector<16x32xf32>
      %c0_19 = arith.constant 0 : index
      %c0_20 = arith.constant 0 : index
      %25 = vector.load %arg8[%c0_19, %c0_20] : memref<16x32xf32, #tpu.memory_space<vmem>>, vector<16x32xf32>
      tpu.vector_store %arg8[%c0_19, %c0_20], %24 {strides = array<i32>} : memref<16x32xf32, #tpu.memory_space<vmem>>, vector<16x32xf32>,
    } else {
    }
    %c0 = arith.constant 0 : index
    %c0_1 = arith.constant 0 : index
    %3 = vector.load %arg3[%c0, %c0_1] : memref<16x32xf32, #tpu.memory_space<vmem>>, vector<16x32xf32>
    %c0_2 = arith.constant 0 : index
    %c0_3 = arith.constant 0 : index
    %4 = vector.load %arg4[%c0_2, %c0_3] : memref<128x32xf32, #tpu.memory_space<vmem>>, vector<128x32xf32>
    %cst = arith.constant dense<0.000000e+00> : vector<16x128xf32>
    %5 = tpu.matmul %3, %4, %cst {dimension_numbers = #tpu.dot_dimension_numbers<[1], [1], [0], [0], [0, 0, 1, 0], [], []>} : vector<16x32xf32>, vector<128x32xf32>, vector<16x128xf32> -> vector<16x128xf32>
    %c0_4 = arith.constant 0 : index
    %c0_5 = arith.constant 0 : index
    %6 = vector.load %arg5[%c0_4, %c0_5] : memref<128x32xf32, #tpu.memory_space<vmem>>, vector<128x32xf32>
    %cst_6 = arith.constant dense<0.000000e+00> : vector<16x128xf32>
    %7 = tpu.matmul %3, %6, %cst_6 {dimension_numbers = #tpu.dot_dimension_numbers<[1], [1], [0], [0], [0, 0, 1, 0], [], []>} : vector<16x32xf32>, vector<128x32xf32>, vector<16x128xf32> -> vector<16x128xf32>
    %cst_7 = arith.constant 0.000000e+00 : f32
    %8 = vector.broadcast %cst_7 : f32 to vector<16x128xf32>
    %9 = arith.subf %8, %5 : vector<16x128xf32>
    %10 = math.exp %9 : vector<16x128xf32>
    %cst_8 = arith.constant 1.000000e+00 : f32
    %11 = vector.broadcast %cst_8 : f32 to vector<16x128xf32>
    %12 = arith.addf %11, %10 : vector<16x128xf32>
    %13 = tpu.reciprocal %12 {approx = true} : vector<16x128xf32> -> vector<16x128xf32>
    %14 = arith.mulf %5, %13 : vector<16x128xf32>
    %15 = arith.mulf %14, %7 : vector<16x128xf32>
    %c0_9 = arith.constant 0 : index
    %c0_10 = arith.constant 0 : index
    %16 = vector.load %arg8[%c0_9, %c0_10] : memref<16x32xf32, #tpu.memory_space<vmem>>, vector<16x32xf32>
    %c0_11 = arith.constant 0 : index
    %c0_12 = arith.constant 0 : index
    %17 = vector.load %arg6[%c0_11, %c0_12] : memref<32x128xf32, #tpu.memory_space<vmem>>, vector<32x128xf32>
    %cst_13 = arith.constant dense<0.000000e+00> : vector<16x32xf32>
    %18 = tpu.matmul %15, %17, %cst_13 {dimension_numbers = #tpu.dot_dimension_numbers<[1], [1], [0], [0], [0, 0, 1, 0], [], []>} : vector<16x128xf32>, vector<32x128xf32>, vector<16x32xf32> -> vector<16x32xf32>
    %19 = arith.addf %16, %18 : vector<16x32xf32>
    %c0_14 = arith.constant 0 : index
    %c0_15 = arith.constant 0 : index
    %20 = vector.load %arg8[%c0_14, %c0_15] : memref<16x32xf32, #tpu.memory_space<vmem>>, vector<16x32xf32>
    tpu.vector_store %arg8[%c0_14, %c0_15], %19 {strides = array<i32>} : memref<16x32xf32, #tpu.memory_space<vmem>>, vector<16x32xf32>,
    %c0_i32_16 = arith.constant 0 : i32
    %21 = arith.cmpi eq, %arg1, %c0_i32_16 : i32
    %22 = arith.extui %21 : i1 to i32
    %c0_i32_17 = arith.constant 0 : i32
    %23 = arith.cmpi ne, %22, %c0_i32_17 : i32
    scf.if %23 {
      %c0_18 = arith.constant 0 : index
      %c0_19 = arith.constant 0 : index
      %24 = vector.load %arg8[%c0_18, %c0_19] : memref<16x32xf32, #tpu.memory_space<vmem>>, vector<16x32xf32>
      %c0_20 = arith.constant 0 : index
      %c0_21 = arith.constant 0 : index
      %25 = vector.load %arg7[%c0_20, %c0_21] : memref<16x32xf32, #tpu.memory_space<vmem>>, vector<16x32xf32>
      tpu.vector_store %arg7[%c0_20, %c0_21], %24 {strides = array<i32>} : memref<16x32xf32, #tpu.memory_space<vmem>>, vector<16x32xf32>,
    } else {
    }
    return
  }
  func.func @transform_0(%arg0: i32, %arg1: i32, %arg2: memref<1xi32, #tpu.memory_space<smem>>) -> (i32, i32) {
    %c0_i32 = arith.constant 0 : i32
    %c0_i32_0 = arith.constant 0 : i32
    return %arg0, %c0_i32 : i32, i32
  }
  func.func @transform_1(%arg0: i32, %arg1: i32, %arg2: memref<1xi32, #tpu.memory_space<smem>>) -> (i32, i32) {
    %c0_i32 = arith.constant 0 : i32
    %c0_i32_0 = arith.constant 0 : i32
    return %arg1, %c0_i32 : i32, i32
  }
  func.func @transform_2(%arg0: i32, %arg1: i32, %arg2: memref<1xi32, #tpu.memory_space<smem>>) -> (i32, i32) {
    %c0_i32 = arith.constant 0 : i32
    %c0_i32_0 = arith.constant 0 : i32
    return %arg1, %c0_i32 : i32, i32
  }
  func.func @transform_3(%arg0: i32, %arg1: i32, %arg2: memref<1xi32, #tpu.memory_space<smem>>) -> (i32, i32) {
    %c0_i32 = arith.constant 0 : i32
    %c0_i32_0 = arith.constant 0 : i32
    return %c0_i32, %arg1 : i32, i32
  }
  func.func @transform_4(%arg0: i32, %arg1: i32, %arg2: memref<1xi32, #tpu.memory_space<smem>>) -> (i32, i32) {
    %c0_i32 = arith.constant 0 : i32
    %c0_i32_0 = arith.constant 0 : i32
    return %arg0, %c0_i32 : i32, i32
  }
}

</mosaic_0001>

<bundles_post_ra>
// kernel: tpu_custom_call.1
= control target key start
LH: loop header
LB: loop body
LE: loop exit
PB: predicated region body
PF: predicated region fallthrough
CT: control target
= control target key end

     0   :  { %11 = vsyncpa [#allocation6], 0  ;;  %s1098_s0 = inlined_call_operand.<no memory space> [shape: s32[1], index: 0, kind: input, shape index: {}]   ;;  %s1099_s1 = inlined_call_operand.hbm [shape: f32[16,32], index: 1, kind: input, shape index: {}]   ;;  %s1100_s2 = inlined_call_operand.hbm [shape: f32[128,32], index: 2, kind: input, shape index: {}]   ;;  %s1101_s3 = inlined_call_operand.hbm [shape: f32[128,32], index: 3, kind: input, shape index: {}]   ;;  %s1102_s4 = inlined_call_operand.hbm [shape: f32[32,128], index: 4, kind: input, shape index: {}]   ;;  %s1103_s5 = inlined_call_operand.hbm [shape: f32[16,32], index: 5, kind: output, shape index: {}]  }
   0x1   :  { %12 = vsyncpa [#allocation9], 0 }
   0x2   :  { %13 = vsyncpa [#allocation12], 0 }
   0x3   :  { %14 = vsyncpa [#allocation7], 0  ;;  %s891_s0 = smov [#allocation8]   ;;  %s892_s19 = smov [#allocation5]  }
   0x4   :  { %s32_s18 = sshll.u32 %s891_s0, 4  ;;  %s20_s20 = sshll.u32 %s892_s19, 4  ;;  %s33_s18 = int_to_ptr.vmem [resolvable:$true] %s32_s18  ;;  %s929_s20 = int_to_ptr.vmem [resolvable:$true] %s20_s20 }
   0x5   :  { %s773_s23 = scalar_lea.hbm %s1100_s2, 2048 }
   0x6   :  { %p774_p0 = scmp.ne.s32.totalorder %s1100_s2, %s773_s23  ;;  %p777_p1 = scmp.lt.u32.totalorder %s773_s23, %s1100_s2 }
   0x8   :  { %p779_p2 = pnand %p777_p1, %p774_p0 }
   0xa   :  { %782 = shalt.err (!%p779_p2)
}
   0xb   :  { %s783_s28 = scalar_lea.vmem %s33_s18, 2048  ;;  %p788_p4 = scmp.lt.s32.totalorder %s33_s18, %s33_s18 }
   0xc   :  { %p784_p3 = scmp.ne.s32.totalorder %s33_s18, %s783_s28  ;;  %p789_p5 = scmp.lt.s32.totalorder %s783_s28, %s783_s28 }
   0xe   :  { %p790_p6 = por %p789_p5, %p788_p4 }
  0x10   :  { %p791_p7 = pnand %p790_p6, %p784_p3 }
  0x12   :  { %794 = shalt.err (!%p791_p7)
}
  0x13   :  { %s893_s29 = smov 128   ;;  %s894_s30 = smov 8  }
  0x14   :  { %38 = dma.hbm_to_vmem [thread:$0]  %s1100_s2, 2048, %s33_s18, [#allocation9], %s893_s29, %s893_s29, %s894_s30  }
  0x15   :  { %s795_s10 = scalar_lea.hbm %s1099_s1, 256 }
  0x16   :  { %p796_p8 = scmp.ne.s32.totalorder %s1099_s1, %s795_s10  ;;  %p799_p9 = scmp.lt.u32.totalorder %s795_s10, %s1099_s1 }
  0x18   :  { %p801_p10 = pnand %p799_p9, %p796_p8 }
  0x1a   :  { %804 = shalt.err (!%p801_p10)
}
  0x1b   :  { %s805_s15 = scalar_lea.vmem %s929_s20, 256  ;;  %p810_p12 = scmp.lt.s32.totalorder %s929_s20, %s929_s20 }
  0x1c   :  { %p806_p11 = scmp.ne.s32.totalorder %s929_s20, %s805_s15  ;;  %p811_p13 = scmp.lt.s32.totalorder %s805_s15, %s805_s15 }
  0x1e   :  { %p812_p0 = por %p811_p13, %p810_p12 }
  0x20   :  { %p813_p1 = pnand %p812_p0, %p806_p11 }
  0x22   :  { %816 = shalt.err (!%p813_p1)
}
  0x23   :  { %26 = dma.hbm_to_vmem [thread:$0]  %s1099_s1, 256, %s929_s20, [#allocation6], %s893_s29, %s893_s29, %s894_s30  }
  0x24   :  { %s895_s17 = smov [#allocation10]   ;;  %s896_s18 = smov [#allocation11]  }
  0x25   :  { %s44_s0 = sshll.u32 %s895_s17, 4  ;;  %s56_s19 = sshll.u32 %s896_s18, 4  ;;  %s45_s0 = int_to_ptr.vmem [resolvable:$true] %s44_s0  ;;  %s966_s19 = int_to_ptr.vmem [resolvable:$true] %s56_s19 }
  0x26   :  { %s817_s23 = scalar_lea.hbm %s1101_s3, 2048 }
  0x27   :  { %p818_p2 = scmp.ne.s32.totalorder %s1101_s3, %s817_s23  ;;  %p821_p3 = scmp.lt.u32.totalorder %s817_s23, %s1101_s3 }
  0x29   :  { %p823_p4 = pnand %p821_p3, %p818_p2 }
  0x2b   :  { %826 = shalt.err (!%p823_p4)
}
  0x2c   :  { %s827_s1 = scalar_lea.vmem %s45_s0, 2048  ;;  %p832_p6 = scmp.lt.s32.totalorder %s45_s0, %s45_s0 }
  0x2d   :  { %p828_p5 = scmp.ne.s32.totalorder %s45_s0, %s827_s1  ;;  %p833_p7 = scmp.lt.s32.totalorder %s827_s1, %s827_s1 }
  0x2f   :  { %p834_p8 = por %p833_p7, %p832_p6 }
  0x31   :  { %p835_p9 = pnand %p834_p8, %p828_p5 }
  0x33   :  { %838 = shalt.err (!%p835_p9)
}
  0x34   :  { %50 = dma.hbm_to_vmem [thread:$0]  %s1101_s3, 2048, %s45_s0, [#allocation9], %s893_s29, %s893_s29, %s894_s30  }
  0x35   :  { %s839_s8 = scalar_lea.hbm %s1102_s4, 512 }
  0x36   :  { %p840_p10 = scmp.ne.s32.totalorder %s1102_s4, %s839_s8  ;;  %p843_p11 = scmp.lt.u32.totalorder %s839_s8, %s1102_s4 }
  0x38   :  { %p845_p12 = pnand %p843_p11, %p840_p10 }
  0x3a   :  { %848 = shalt.err (!%p845_p12)
}
  0x3b   :  { %s849_s13 = scalar_lea.vmem %s966_s19, 512  ;;  %p854_p0 = scmp.lt.s32.totalorder %s966_s19, %s966_s19 }
  0x3c   :  { %p850_p13 = scmp.ne.s32.totalorder %s966_s19, %s849_s13  ;;  %p855_p1 = scmp.lt.s32.totalorder %s849_s13, %s849_s13 }
  0x3e   :  { %p856_p2 = por %p855_p1, %p854_p0 }
  0x40   :  { %p857_p3 = pnand %p856_p2, %p850_p13 }
  0x42   :  { %860 = shalt.err (!%p857_p3)
}
  0x43   :  { %62 = dma.hbm_to_vmem [thread:$0]  %s1102_s4, 512, %s966_s19, [#allocation12], %s893_s29, %s893_s29, %s894_s30  }
  0x44   :  { %883 = dma.done.wait [#allocation6], 256  }
  0x45   :  { %884 = vsyncadd [#allocation6], 4294967040 }
  0x46   :  { %885 = dma.done.wait [#allocation9], 4096  }
  0x47   :  { %886 = vsyncadd [#allocation9], 4294963200 }
  0x48   :  { %887 = dma.done.wait [#allocation12], 512  }
  0x49   :  { %888 = vsyncadd [#allocation12], 4294966784  ;;  %vm79_vm0 = vcmask 261120   ;;  %v84_v1 = vld [vmem:[#allocation8] sm:$0xff]  ;;  %v85_v2 = vld [vmem:[#allocation8 + $0x8] sm:$0xff]  ;;  %v897_v57 = vmov 0.0  }
  0x4a   :  { %vm1005_vm1 = vmpackc.low %vm79_vm0, %vm79_vm0  ;;  %v86_v3 = vld [vmem:[#allocation8 + $0x10] sm:$0xff]  ;;  %v653_v4 = vpack.c.bf16 %v85_v2, %v84_v1  ;;  %v87_v5 = vld [vmem:[#allocation8 + $0x18] sm:$0xff]  ;;  %81 = vst.msk [vmem:[#allocation2 + $0x8] sm:$0xff] %vm79_vm0, %v897_v57  ;;  %s898_s4 = smov [#allocation13]  }
  0x4b   :  { %v659_v6 = vpack.c.bf16 %v87_v5, %v86_v3  ;;  %v230_v7 = vld [vmem:[#allocation10] sm:$0xff]  ;;  %v231_v8 = vld [vmem:[#allocation10 + $0x8] sm:$0xff]  ;;  %v232_v10 = vld [vmem:[#allocation10 + $0x10] sm:$0xff]  ;;  %80 = vst.msk [vmem:[#allocation2] sm:$0xff] %vm79_vm0, %v897_v57  ;;  %s480_s15 = sshll.u32 %s898_s4, 4  ;;  %s481_s15 = int_to_ptr.vmem [resolvable:$true] %s480_s15 }
  0x4c   :  { %655 = vmatprep.subr.msk.bf16.mxu0 %vm1005_vm1, %v653_v4  ;;  %v701_v9 = vpack.c.bf16 %v231_v8, %v230_v7  ;;  %v233_v11 = vld [vmem:[#allocation10 + $0x18] sm:$0xff]  ;;  %v88_v13 = vld [vmem:[#allocation8 + $0x20] sm:$0xff]  ;;  %v89_v14 = vld [vmem:[#allocation8 + $0x28] sm:$0xff]  ;;  %s861_s2 = scalar_lea.vmem %s481_s15, 256  ;;  %p866_p5 = scmp.lt.s32.totalorder %s481_s15, %s481_s15 }
  0x4d   :  { %658 = vmatpush3.bf16.xpose.msk.msra.mxu0 %vm1005_vm1, %v653_v4  ;;  %v707_v12 = vpack.c.bf16 %v233_v11, %v232_v10  ;;  %v82_v15 = vld [vmem:[#allocation5] sm:$0xff]  ;;  %v665_v16 = vpack.c.bf16 %v89_v14, %v88_v13  ;;  %v234_v17 = vld [vmem:[#allocation10 + $0x20] sm:$0xff]  ;;  %v235_v18 = vld [vmem:[#allocation10 + $0x28] sm:$0xff]  ;;  %p862_p4 = scmp.ne.s32.totalorder %s481_s15, %s861_s2  ;;  %p867_p6 = scmp.lt.s32.totalorder %s861_s2, %s861_s2 }
  0x4e   :  { %661 = vmatprep.subr.msk.bf16.mxu0 %vm1005_vm1, %v659_v6  ;;  %703 = vmatprep.subr.msk.bf16.mxu1 %vm1005_vm1, %v701_v9  ;;  %v713_v19 = vpack.c.bf16 %v235_v18, %v234_v17  ;;  %v90_v20 = vld [vmem:[#allocation8 + $0x30] sm:$0xff]  ;;  %v91_v21 = vld [vmem:[#allocation8 + $0x38] sm:$0xff]  ;;  %v92_v26 = vld [vmem:[#allocation8 + $0x40] sm:$0xff] }
  0x4f   :  { %706 = vmatpush3.bf16.xpose.msk.msra.mxu1 %vm1005_vm1, %v701_v9  ;;  %604 = vmatprep.mubr.msk.f32.mxu0 %vm79_vm0, %v82_v15  ;;  %v671_v22 = vpack.c.bf16 %v91_v21, %v90_v20  ;;  %v236_v23 = vld [vmem:[#allocation10 + $0x30] sm:$0xff]  ;;  %v237_v24 = vld [vmem:[#allocation10 + $0x38] sm:$0xff]  ;;  %v93_v27 = vld [vmem:[#allocation8 + $0x48] sm:$0xff]  ;;  %p868_p7 = por %p867_p6, %p866_p5 }
  0x50   :  { %709 = vmatprep.subr.msk.bf16.mxu1 %vm1005_vm1, %v707_v12  ;;  %639 = vmatprep.mubr.msk.f32.mxu1 %vm79_vm0, %v82_v15  ;;  %v719_v25 = vpack.c.bf16 %v237_v24, %v236_v23  ;;  %v677_v28 = vpack.c.bf16 %v93_v27, %v92_v26  ;;  %v238_v29 = vld [vmem:[#allocation10 + $0x40] sm:$0xff]  ;;  %v239_v30 = vld [vmem:[#allocation10 + $0x48] sm:$0xff]  ;;  %v94_v32 = vld [vmem:[#allocation8 + $0x50] sm:$0xff] }
  0x51   :  { %v725_v31 = vpack.c.bf16 %v239_v30, %v238_v29  ;;  %v95_v33 = vld [vmem:[#allocation8 + $0x58] sm:$0xff]  ;;  %v240_v35 = vld [vmem:[#allocation10 + $0x50] sm:$0xff]  ;;  %v96_v38 = vld [vmem:[#allocation8 + $0x60] sm:$0xff]  ;;  %p869_p8 = pnand %p868_p7, %p862_p4 }
  0x52   :  { %v683_v34 = vpack.c.bf16 %v95_v33, %v94_v32  ;;  %v241_v36 = vld [vmem:[#allocation10 + $0x58] sm:$0xff]  ;;  %v97_v39 = vld [vmem:[#allocation8 + $0x68] sm:$0xff]  ;;  %v242_v41 = vld [vmem:[#allocation10 + $0x60] sm:$0xff] }
  0x53   :  { %v731_v37 = vpack.c.bf16 %v241_v36, %v240_v35  ;;  %v689_v40 = vpack.c.bf16 %v97_v39, %v96_v38  ;;  %v243_v42 = vld [vmem:[#allocation10 + $0x68] sm:$0xff]  ;;  %v98_v44 = vld [vmem:[#allocation8 + $0x70] sm:$0xff]  ;;  %v99_v45 = vld [vmem:[#allocation8 + $0x78] sm:$0xff] }
  0x54   :  { %v737_v43 = vpack.c.bf16 %v243_v42, %v242_v41  ;;  %v695_v46 = vpack.c.bf16 %v99_v45, %v98_v44  ;;  %v244_v47 = vld [vmem:[#allocation10 + $0x70] sm:$0xff]  ;;  %v245_v48 = vld [vmem:[#allocation10 + $0x78] sm:$0xff]  ;;  %v385_v51 = vld [vmem:[#allocation11] sm:$0xff] }
  0x55   :  { %664 = vmatpush3.bf16.xpose.msk.msra.mxu0 %vm1005_vm1, %v659_v6  ;;  %v743_v49 = vpack.c.bf16 %v245_v48, %v244_v47  ;;  %v83_v50 = vld [vmem:[#allocation5 + $0x8] sm:$0xff]  ;;  %v386_v52 = vld [vmem:[#allocation11 + $0x8] sm:$0xff]  ;;  %v387_v54 = vld [vmem:[#allocation11 + $0x10] sm:$0xff] }
  0x56   :  { %667 = vmatprep.subr.msk.bf16.mxu0 %vm1005_vm1, %v665_v16  ;;  %v749_v53 = vpack.c.bf16 %v386_v52, %v385_v51  ;;  %v388_v55 = vld [vmem:[#allocation11 + $0x18] sm:$0xff]  ;;  %v383_v13 = vld [vmem:[#allocation2] sm:$0xff] }
  0x57   :  { %712 = vmatpush3.bf16.xpose.msk.msra.mxu1 %vm1005_vm1, %v707_v12  ;;  %v753_v56 = vpack.c.bf16 %v388_v55, %v387_v54  ;;  %v384_v12 = vld [vmem:[#allocation2 + $0x8] sm:$0xff] }
  0x58   :  { %715 = vmatprep.subr.msk.bf16.mxu1 %vm1005_vm1, %v713_v19 }
  0x5d   :  { %670 = vmatpush3.bf16.xpose.msk.msra.mxu0 %vm1005_vm1, %v665_v16 }
  0x5e   :  { %673 = vmatprep.subr.msk.bf16.mxu0 %vm1005_vm1, %v671_v22 }
  0x5f   :  { %718 = vmatpush3.bf16.xpose.msk.msra.mxu1 %vm1005_vm1, %v713_v19 }
  0x60   :  { %721 = vmatprep.subr.msk.bf16.mxu1 %vm1005_vm1, %v719_v25 }
  0x65   :  { %676 = vmatpush3.bf16.xpose.msk.msra.mxu0 %vm1005_vm1, %v671_v22 }
  0x66   :  { %679 = vmatprep.subr.msk.bf16.mxu0 %vm1005_vm1, %v677_v28 }
  0x67   :  { %724 = vmatpush3.bf16.xpose.msk.msra.mxu1 %vm1005_vm1, %v719_v25 }
  0x68   :  { %727 = vmatprep.subr.msk.bf16.mxu1 %vm1005_vm1, %v725_v31 }
  0x6d   :  { %682 = vmatpush3.bf16.xpose.msk.msra.mxu0 %vm1005_vm1, %v677_v28 }
  0x6e   :  { %685 = vmatprep.subr.msk.bf16.mxu0 %vm1005_vm1, %v683_v34 }
  0x6f   :  { %730 = vmatpush3.bf16.xpose.msk.msra.mxu1 %vm1005_vm1, %v725_v31 }
  0x70   :  { %733 = vmatprep.subr.msk.bf16.mxu1 %vm1005_vm1, %v731_v37 }
  0x75   :  { %688 = vmatpush3.bf16.xpose.msk.msra.mxu0 %vm1005_vm1, %v683_v34 }
  0x76   :  { %691 = vmatprep.subr.msk.bf16.mxu0 %vm1005_vm1, %v689_v40 }
  0x77   :  { %736 = vmatpush3.bf16.xpose.msk.msra.mxu1 %vm1005_vm1, %v731_v37 }
  0x78   :  { %739 = vmatprep.subr.msk.bf16.mxu1 %vm1005_vm1, %v737_v43 }
  0x7d   :  { %694 = vmatpush3.bf16.xpose.msk.msra.mxu0 %vm1005_vm1, %v689_v40 }
  0x7e   :  { %697 = vmatprep.subr.msk.bf16.mxu0 %vm1005_vm1, %v695_v46 }
  0x7f   :  { %742 = vmatpush3.bf16.xpose.msk.msra.mxu1 %vm1005_vm1, %v737_v43 }
  0x80   :  { %745 = vmatprep.subr.msk.bf16.mxu1 %vm1005_vm1, %v743_v49 }
  0x85   :  { %700 = vmatpush3.bf16.xpose.msk.msra.mxu0 %vm1005_vm1, %v695_v46 }
  0x86   :  { %750 = vmatprep.subr.bf16.mxu0 %v749_v53 }
  0x87   :  { %748 = vmatpush3.bf16.xpose.msk.msra.mxu1 %vm1005_vm1, %v743_v49 }
  0x8c   :  { %605 = vmatmul.mubr.msk.f32.vlgmr.msra.gmra.mrb[0].mxu0 %vm79_vm0, %v83_v50 }
  0x8d   :  { %752 = vmatpush3.bf16.xpose.msra.mxu0 %v749_v53 }
  0x8e   :  { %640 = vmatmul.mubr.msk.f32.vlgmr.msra.gmra.mrb[0].mxu1 %vm79_vm0, %v83_v50  ;;  %754 = vmatprep.subr.bf16.mxu0 %v753_v56 }
  0x95   :  { %756 = vmatpush3.bf16.xpose.msra.mxu0 %v753_v56 }
 0x15f   :  { %v606_v58 = vpop.f32.mrb[0].mxu0 }
 0x160   :  { %v370_v59 = vsub.f32 0.0, %v606_v58  ;;  %v221_v60 = vpop.f32.mrb[1].mxu0 }
 0x161   :  { %v369_v61 = vsub.f32 0.0, %v221_v60  ;;  %v641_v63 = vpop.f32.mrb[0].mxu1 }
 0x162   :  { %v373_v62 = vmul.f32 1.442695, %v370_v59  ;;  %v360_v1 = vpop.f32.mrb[1].mxu1 }
 0x163   :  { %v371_v0 = vmul.f32 1.442695, %v369_v61 }
 0x164   :  { %765 = vpow2.f32 %v373_v62 }
 0x165   :  { %767 = vpow2.f32 %v371_v0 }
 0x16e   :  { %v766_v2 = vpop.eup %765 }
 0x16f   :  { %v768_v3 = vpop.eup %767  ;;  %v376_v4 = vadd.f32 1.0, %v766_v2 }
 0x170   :  { %v375_v5 = vadd.f32 1.0, %v768_v3 }
 0x171   :  { %769 = vrcp.f32 %v376_v4 }
 0x172   :  { %771 = vrcp.f32 %v375_v5 }
 0x17b   :  { %v770_v6 = vpop.eup %769 }
 0x17c   :  { %v772_v7 = vpop.eup %771  ;;  %v380_v8 = vmul.f32 %v770_v6, %v606_v58 }
 0x17d   :  { %v379_v9 = vmul.f32 %v772_v7, %v221_v60 }
 0x17e   :  { %v382_v10 = vmul.f32 %v641_v63, %v380_v8 }
 0x17f   :  { %v381_v11 = vmul.f32 %v379_v9, %v360_v1 }
 0x181   :  { %650 = vmatprep.mubr.f32.mxu0 %v381_v11 }
 0x182   :  { %651 = vmatmul.mubr.f32.vlgmr.msra.gmra.mrb[2].mxu0 %v382_v10 }
 0x255   :  { %v652_v14 = vpop.f32.mrb[2].mxu0 }
 0x256   :  { %v465_v15 = vadd.f32 %v652_v14, %v384_v12  ;;  %v455_v16 = vpop.f32.mrb[3].mxu0 }
 0x257   :  { %v464_v17 = vadd.f32 %v455_v16, %v383_v13 }
 0x258   :  { %467 = vst.msk [vmem:[#allocation2 + $0x8] sm:$0xff] %vm79_vm0, %v465_v15 }
 0x259   :  { %466 = vst.msk [vmem:[#allocation2] sm:$0xff] %vm79_vm0, %v464_v17 }
 0x25f   :  { %v472_v18 = vld [vmem:[#allocation2 + $0x8] sm:$0xff] }
 0x260   :  { %v471_v19 = vld [vmem:[#allocation2] sm:$0xff]  ;;  %474 = vst.msk [vmem:[#allocation13 + $0x8] sm:$0xff] %vm79_vm0, %v472_v18 }
 0x261   :  { %473 = vst.msk [vmem:[#allocation13] sm:$0xff] %vm79_vm0, %v471_v19 }
 0x262   :  { %872 = shalt.err (!%p869_p8)
}
 0x263   :  { %s873_s0 = scalar_lea.hbm %s1103_s5, 256 }
 0x264   :  { %p874_p9 = scmp.ne.s32.totalorder %s1103_s5, %s873_s0  ;;  %p877_p10 = scmp.lt.u32.totalorder %s873_s0, %s1103_s5 }
 0x266   :  { %p879_p11 = pnand %p877_p10, %p874_p9 }
 0x268   :  { %882 = shalt.err (!%p879_p11)
}
 0x269   :  { %486 = dma.vmem_to_hbm [thread:$0]  %s481_s15, 256, %s1103_s5, [#allocation7], %s893_s29, %s893_s29, %s894_s30  }
 0x26a   :  { %889 = dma.done.wait [#allocation7], 256  }
 0x26b   :  { %890 = vsyncadd [#allocation7], 4294967040 }
 0x26c   :  { %490 = vsyncpa [#allocation6], 1 }
 0x26d   :  { %491 = vsyncpa [#allocation9], 1 }
 0x26e   :  { %492 = vsyncpa [#allocation12], 1 }
 0x26f   :  { %493 = vsyncpa [#allocation7], 1 }

</bundles_post_ra>
